<compile_context>
chip_gen: v7x
topology: tpu7x:2x2x1
jax: 0.10.0
libtpu: 0.0.40
codegen_flags: <defaults>
</compile_context>

<pallas_src>
import jax
import jax.numpy as jnp
from jax.experimental import pallas as pl
from jax.experimental.pallas import tpu as pltpu


def _scale_mul_kernel(scale_ref, x_ref, o_ref):
    # scale_ref: (Cb, 1) tile; x_ref / o_ref: (Cb, HW) tiles.
    # (Cb, 1) * (Cb, HW) broadcasts along lanes inside each vreg.
    o_ref[...] = scale_ref[...] * x_ref[...]


def channel_scale_mul(scale, x):
    """scale: (N, C, 1, 1), x: (N, C, H, W) -> (N, C, H, W), broadcasted mul."""
    assert scale.shape[0] == x.shape[0] and scale.shape[1] == x.shape[1]
    assert scale.shape[2] == 1 and scale.shape[3] == 1
    N, C, H, W = x.shape
    HW = H * W
    rows = N * C

    x2 = x.reshape(rows, HW)       # (rows, HW)
    s2 = scale.reshape(rows, 1)    # (rows, 1)

    # Pick the number of row-blocks: prefer 4 (two pipelined steps per v7x
    # TensorCore, better DMA/compute overlap on single-TC chips), fall back
    # to 2, then 1. Each block's sublane count must stay a multiple of 8.
    if rows % 32 == 0:
        n_blocks = 4
    elif rows % 16 == 0:
        n_blocks = 2
    else:
        n_blocks = 1
    Cb = rows // n_blocks
    grid = (n_blocks,)

    itemsize = jnp.dtype(x.dtype).itemsize
    cost = pl.CostEstimate(
        flops=rows * HW,                                   # one mul per element
        transcendentals=0,
        bytes_accessed=2 * rows * HW * itemsize + rows * itemsize,
    )

    out2 = pl.pallas_call(
        _scale_mul_kernel,
        out_shape=jax.ShapeDtypeStruct((rows, HW), x.dtype),
        grid_spec=pltpu.PrefetchScalarGridSpec(
            num_scalar_prefetch=0,
            grid=grid,
            in_specs=[
                pl.BlockSpec((Cb, 1), lambda i: (i, 0)),
                pl.BlockSpec((Cb, HW), lambda i: (i, 0)),
            ],
            out_specs=pl.BlockSpec((Cb, HW), lambda i: (i, 0)),
        ),
        compiler_params=pltpu.CompilerParams(
            dimension_semantics=("parallel",),
        ),
        cost_estimate=cost,
    )(s2, x2)

    return out2.reshape(N, C, H, W)


if __name__ == "__main__":
    key = jax.random.PRNGKey(0)
    k1, k2 = jax.random.split(key)

    # Shapes implied by the module's forward pass.
    x262 = jax.random.normal(k1, (1, 1056, 14, 14), dtype=jnp.float32)
    x267 = jax.random.normal(k2, (1, 1056, 1, 1), dtype=jnp.float32)

    out = channel_scale_mul(x267, x262)
    out = jax.block_until_ready(out)

    # Sanity check against plain JAX broadcasting semantics.
    ref = x267 * x262
    assert out.shape == (1, 1056, 14, 14)
    assert jnp.allclose(out, ref, atol=1e-6, rtol=1e-6)

    print("KERNEL_OK")
</pallas_src>

<mosaic_0001>
module attributes {stable_mosaic.version = 11 : i64} {
  func.func @_scale_mul_kernel(%arg0: i32, %arg1: memref<264x1xf32, #tpu.memory_space<vmem>>, %arg2: memref<264x196xf32, #tpu.memory_space<vmem>>, %arg3: memref<264x196xf32, #tpu.memory_space<vmem>>) attributes {dimension_semantics = [#tpu.dimension_semantics<parallel>], iteration_bounds = array<i64: 4>, scalar_prefetch = 0 : i64, scratch_operands = 0 : i64, tpu.core_type = #tpu.core_type<tc>, window_params = [{transform_indices = @transform_0, window_bounds = array<i64: 264, 1>}, {transform_indices = @transform_1, window_bounds = array<i64: 264, 196>}, {transform_indices = @transform_2, window_bounds = array<i64: 264, 196>}]} {
    %c0 = arith.constant 0 : index
    %c0_0 = arith.constant 0 : index
    %0 = vector.load %arg1[%c0, %c0_0] : memref<264x1xf32, #tpu.memory_space<vmem>>, vector<264x1xf32>
    %c0_1 = arith.constant 0 : index
    %c0_2 = arith.constant 0 : index
    %1 = vector.load %arg2[%c0_1, %c0_2] : memref<264x196xf32, #tpu.memory_space<vmem>>, vector<264x196xf32>
    %2 = vector.broadcast %0 : vector<264x1xf32> to vector<264x196xf32>
    %3 = arith.mulf %2, %1 : vector<264x196xf32>
    %c0_3 = arith.constant 0 : index
    %c0_4 = arith.constant 0 : index
    %4 = vector.load %arg3[%c0_3, %c0_4] : memref<264x196xf32, #tpu.memory_space<vmem>>, vector<264x196xf32>
    tpu.vector_store %arg3[%c0_3, %c0_4], %3 {strides = array<i32>} : memref<264x196xf32, #tpu.memory_space<vmem>>, vector<264x196xf32>,
    return
  }
  func.func @transform_0(%arg0: i32) -> (i32, i32) {
    %c0_i32 = arith.constant 0 : i32
    %c0_i32_0 = arith.constant 0 : i32
    return %arg0, %c0_i32 : i32, i32
  }
  func.func @transform_1(%arg0: i32) -> (i32, i32) {
    %c0_i32 = arith.constant 0 : i32
    %c0_i32_0 = arith.constant 0 : i32
    return %arg0, %c0_i32 : i32, i32
  }
  func.func @transform_2(%arg0: i32) -> (i32, i32) {
    %c0_i32 = arith.constant 0 : i32
    %c0_i32_0 = arith.constant 0 : i32
    return %arg0, %c0_i32 : i32, i32
  }
}

</mosaic_0001>

<bundles_post_ra>
// kernel: tpu_custom_call.1
= control target key start
LH: loop header
LB: loop body
LE: loop exit
PB: predicated region body
PF: predicated region fallthrough
CT: control target
= control target key end

     0   :  { %s690_s9 = smov 0   ;;  %s918_s0 = inlined_call_operand.vmem [shape: f32[1056,1], index: 0, kind: input, shape index: {}]   ;;  %s919_s1 = inlined_call_operand.vmem [shape: f32[1056,196], index: 1, kind: input, shape index: {}]   ;;  %s920_s2 = inlined_call_operand.vmem [shape: f32[1056,196], index: 2, kind: output, shape index: {}]  }
   0x1 LB: > { %s641_s10 = sadd.s32 4294967295, %s672_s9   ;;  %p645_p0 = scmp.ge.s32.totalorder %s672_s9, 1  ;;  %s672_s9 = sphi %s690_s9, %s12_s9  }
   0x2   : > { %p125_p1 = scmp.lt.s32.totalorder %s672_s9, 5 }
   0x4   : > { %p126_p2 = pnand %p645_p0, %p125_p1 }
   0x5   : > { %s154_s11 = smul.u32 (!%p126_p2), 33, %s641_s10  ;;  %v674_v0 = vmov (!%p126_p2), 0   ;;  %vm505_vm0 = vcmask (!%p126_p2), 556032  }
   0x6   : > { %129 = sbr.rel (%p126_p2) target bundleno = 212 (0xd4), region = 28  ;;  %665 = vset.pattern.permute.xlu1 (!%p126_p2), %v674_v0  ;;  %664 = vset.pattern.permute.xlu0 (!%p126_p2), %v674_v0 }
   0x7   : > { %p155_p3 = scmp.lt.s32.totalorder (!%p126_p2), %s154_s11, 131 }
   0xd   : > { %s922_s11 = smov (!%p155_p3, %s154_s11), 131 }
   0xe   : > { %s646_s12 = sshll.u32 %s922_s11, 3  ;;  %s653_s16 = sshll.u32 %s922_s11, 4 }
   0xf   : > { %s704_s15 = scalar_lea.vmem %s918_s0, %s646_s12  ;;  %s743_s19 = scalar_lea.vmem %s919_s1, %s653_s16 }
  0x10   : > { %v176_v1 = vld [vmem:[%s704_s15 + $0x10] sm:$0xff]  ;;  %v174_v2 = vld [vmem:[%s704_s15] sm:$0xff]  ;;  %v177_v3 = vld [vmem:[%s704_s15 + $0x18] sm:$0xff]  ;;  %s752_s22 = scalar_lea.vmem %s920_s2, %s653_s16 }
  0x11   : > { %285 = vperm.xlu1 %665, %v176_v1   ;;  %275 = vperm.xlu0 %664, %v174_v2   ;;  %v175_v4 = vld [vmem:[%s704_s15 + $0x8] sm:$0xff]  ;;  %v178_v6 = vld [vmem:[%s704_s15 + $0x20] sm:$0xff]  ;;  %v181_v7 = vld [vmem:[%s704_s15 + $0x38] sm:$0xff] }
  0x12   : > { %v179_v5 = vld [vmem:[%s704_s15 + $0x28] sm:$0xff]  ;;  %v180_v8 = vld [vmem:[%s704_s15 + $0x30] sm:$0xff]  ;;  %v182_v10 = vld [vmem:[%s704_s15 + $0x40] sm:$0xff] }
  0x13   : > { %v183_v9 = vld [vmem:[%s704_s15 + $0x48] sm:$0xff]  ;;  %v185_v11 = vld [vmem:[%s704_s15 + $0x58] sm:$0xff]  ;;  %v184_v12 = vld [vmem:[%s704_s15 + $0x50] sm:$0xff] }
  0x14   : > { %v187_v13 = vld [vmem:[%s704_s15 + $0x68] sm:$0xff]  ;;  %v186_v14 = vld [vmem:[%s704_s15 + $0x60] sm:$0xff]  ;;  %v189_v15 = vld [vmem:[%s704_s15 + $0x78] sm:$0xff] }
  0x15   : > { %290 = vperm.xlu1 %665, %v177_v3   ;;  %280 = vperm.xlu0 %664, %v175_v4   ;;  %v188_v16 = vld [vmem:[%s704_s15 + $0x70] sm:$0xff]  ;;  %v191_v17 = vld [vmem:[%s704_s15 + $0x88] sm:$0xff]  ;;  %v190_v18 = vld [vmem:[%s704_s15 + $0x80] sm:$0xff] }
  0x16   : > { %v193_v19 = vld [vmem:[%s704_s15 + $0x98] sm:$0xff]  ;;  %v192_v20 = vld [vmem:[%s704_s15 + $0x90] sm:$0xff]  ;;  %v195_v21 = vld [vmem:[%s704_s15 + $0xa8] sm:$0xff] }
  0x17   : > { %v194_v22 = vld [vmem:[%s704_s15 + $0xa0] sm:$0xff]  ;;  %v197_v23 = vld [vmem:[%s704_s15 + $0xb8] sm:$0xff]  ;;  %v196_v24 = vld [vmem:[%s704_s15 + $0xb0] sm:$0xff] }
  0x18   : > { %v199_v25 = vld [vmem:[%s704_s15 + $0xc8] sm:$0xff]  ;;  %v198_v26 = vld [vmem:[%s704_s15 + $0xc0] sm:$0xff]  ;;  %v201_v27 = vld [vmem:[%s704_s15 + $0xd8] sm:$0xff] }
  0x19   : > { %300 = vperm.xlu1 %665, %v179_v5   ;;  %295 = vperm.xlu0 %664, %v178_v6   ;;  %v200_v28 = vld [vmem:[%s704_s15 + $0xd0] sm:$0xff]  ;;  %v203_v29 = vld [vmem:[%s704_s15 + $0xe8] sm:$0xff]  ;;  %v202_v30 = vld [vmem:[%s704_s15 + $0xe0] sm:$0xff] }
  0x1a   : > { %v205_v31 = vld [vmem:[%s704_s15 + $0xf8] sm:$0xff]  ;;  %v204_v32 = vld [vmem:[%s704_s15 + $0xf0] sm:$0xff]  ;;  %v206_v33 = vld [vmem:[%s704_s15 + $0x100] sm:$0xff] }
  0x1b   : > { %v211_v34 = vld [vmem:[%s743_s19 + $0x20] sm:$0xff]  ;;  %v212_v35 = vld [vmem:[%s743_s19 + $0x28] sm:$0xff]  ;;  %v213_v44 = vld [vmem:[%s743_s19 + $0x30] sm:$0xff] }
  0x1c   : > { %v207_v36 = vld [vmem:[%s743_s19] sm:$0xff]  ;;  %v208_v37 = vld [vmem:[%s743_s19 + $0x8] sm:$0xff]  ;;  %v214_v45 = vld [vmem:[%s743_s19 + $0x38] sm:$0xff] }
  0x1d   : > { %310 = vperm.xlu1 %665, %v181_v7   ;;  %305 = vperm.xlu0 %664, %v180_v8   ;;  %v209_v46 = vld [vmem:[%s743_s19 + $0x10] sm:$0xff]  ;;  %v210_v47 = vld [vmem:[%s743_s19 + $0x18] sm:$0xff]  ;;  %v215_v56 = vld [vmem:[%s743_s19 + $0x40] sm:$0xff] }
  0x1e   : > { %v217_v54 = vld [vmem:[%s743_s19 + $0x50] sm:$0xff]  ;;  %v218_v55 = vld [vmem:[%s743_s19 + $0x58] sm:$0xff]  ;;  %v216_v57 = vld [vmem:[%s743_s19 + $0x48] sm:$0xff] }
  0x1f   : > { %v221_v0 = vld [vmem:[%s743_s19 + $0x70] sm:$0xff]  ;;  %v222_v1 = vld [vmem:[%s743_s19 + $0x78] sm:$0xff]  ;;  %v219_v2 = vld [vmem:[%s743_s19 + $0x60] sm:$0xff] }
  0x20   : > { %v220_v3 = vld [vmem:[%s743_s19 + $0x68] sm:$0xff] }
  0x21   : > { %320 = vperm.xlu1 %665, %v183_v9   ;;  %315 = vperm.xlu0 %664, %v182_v10   ;;  %v225_v10 = vld [vmem:[%s743_s19 + $0x90] sm:$0xff] }
  0x25   : > { %330 = vperm.xlu1 %665, %v185_v11   ;;  %325 = vperm.xlu0 %664, %v184_v12   ;;  %v226_v11 = vld [vmem:[%s743_s19 + $0x98] sm:$0xff]  ;;  %v223_v12 = vld [vmem:[%s743_s19 + $0x80] sm:$0xff] }
  0x29   : > { %340 = vperm.xlu1 %665, %v187_v13   ;;  %335 = vperm.xlu0 %664, %v186_v14   ;;  %v224_v13 = vld [vmem:[%s743_s19 + $0x88] sm:$0xff] }
  0x2d   : > { %350 = vperm.xlu1 %665, %v189_v15   ;;  %345 = vperm.xlu0 %664, %v188_v16  }
  0x31   : > { %360 = vperm.xlu1 %665, %v191_v17   ;;  %355 = vperm.xlu0 %664, %v190_v18  }
  0x35   : > { %370 = vperm.xlu1 %665, %v193_v19   ;;  %365 = vperm.xlu0 %664, %v192_v20   ;;  %v229_v20 = vld [vmem:[%s743_s19 + $0xb0] sm:$0xff] }
  0x39   : > { %380 = vperm.xlu1 %665, %v195_v21   ;;  %375 = vperm.xlu0 %664, %v194_v22   ;;  %v230_v21 = vld [vmem:[%s743_s19 + $0xb8] sm:$0xff]  ;;  %v227_v22 = vld [vmem:[%s743_s19 + $0xa0] sm:$0xff] }
  0x3d   : > { %390 = vperm.xlu1 %665, %v197_v23   ;;  %385 = vperm.xlu0 %664, %v196_v24   ;;  %v228_v23 = vld [vmem:[%s743_s19 + $0xa8] sm:$0xff] }
  0x41   : > { %400 = vperm.xlu1 %665, %v199_v25   ;;  %395 = vperm.xlu0 %664, %v198_v26  }
  0x45   : > { %410 = vperm.xlu1 %665, %v201_v27   ;;  %405 = vperm.xlu0 %664, %v200_v28  }
  0x49   : > { %420 = vperm.xlu1 %665, %v203_v29   ;;  %415 = vperm.xlu0 %664, %v202_v30   ;;  %v233_v30 = vld [vmem:[%s743_s19 + $0xd0] sm:$0xff] }
  0x4d   : > { %430 = vperm.xlu1 %665, %v205_v31   ;;  %425 = vperm.xlu0 %664, %v204_v32   ;;  %v234_v31 = vld [vmem:[%s743_s19 + $0xd8] sm:$0xff]  ;;  %v231_v32 = vld [vmem:[%s743_s19 + $0xc0] sm:$0xff] }
  0x51   : > { %435 = vperm.xlu0 %664, %v206_v33   ;;  %v232_v33 = vld [vmem:[%s743_s19 + $0xc8] sm:$0xff] }
  0x90   : > { %v286_v38 = vpop.permute.xlu1 %285  ;;  %v276_v39 = vpop.permute.xlu0 %275 }
  0x91   : > { %v442_v40 = vmul.f32 %v286_v38, %v211_v34  ;;  %v443_v41 = vmul.f32 %v286_v38, %v212_v35  ;;  %v438_v42 = vmul.f32 %v276_v39, %v207_v36  ;;  %v439_v43 = vmul.f32 %v276_v39, %v208_v37 }
  0x93   : > { %509 = vst [vmem:[%s752_s22 + $0x20] sm:$0xff] %v442_v40  ;;  %510 = vst.msk [vmem:[%s752_s22 + $0x28] sm:$0xff] %vm505_vm0, %v443_v41  ;;  %v237_v40 = vld [vmem:[%s743_s19 + $0xf0] sm:$0xff]  ;;  %v238_v41 = vld [vmem:[%s743_s19 + $0xf8] sm:$0xff] }
  0x94   : > { %504 = vst [vmem:[%s752_s22] sm:$0xff] %v438_v42  ;;  %506 = vst.msk [vmem:[%s752_s22 + $0x8] sm:$0xff] %vm505_vm0, %v439_v43  ;;  %v291_v48 = vpop.permute.xlu1 %290  ;;  %v281_v49 = vpop.permute.xlu0 %280  ;;  %v235_v42 = vld [vmem:[%s743_s19 + $0xe0] sm:$0xff]  ;;  %v236_v43 = vld [vmem:[%s743_s19 + $0xe8] sm:$0xff] }
  0x95   : > { %v444_v50 = vmul.f32 %v291_v48, %v213_v44  ;;  %v445_v51 = vmul.f32 %v291_v48, %v214_v45  ;;  %v440_v52 = vmul.f32 %v281_v49, %v209_v46  ;;  %v441_v53 = vmul.f32 %v281_v49, %v210_v47 }
  0x97   : > { %511 = vst [vmem:[%s752_s22 + $0x30] sm:$0xff] %v444_v50  ;;  %512 = vst.msk [vmem:[%s752_s22 + $0x38] sm:$0xff] %vm505_vm0, %v445_v51  ;;  %v241_v50 = vld [vmem:[%s743_s19 + $0x110] sm:$0xff]  ;;  %v242_v51 = vld [vmem:[%s743_s19 + $0x118] sm:$0xff] }
  0x98   : > { %507 = vst [vmem:[%s752_s22 + $0x10] sm:$0xff] %v440_v52  ;;  %508 = vst.msk [vmem:[%s752_s22 + $0x18] sm:$0xff] %vm505_vm0, %v441_v53  ;;  %v301_v58 = vpop.permute.xlu1 %300  ;;  %v296_v59 = vpop.permute.xlu0 %295  ;;  %v239_v52 = vld [vmem:[%s743_s19 + $0x100] sm:$0xff]  ;;  %v240_v53 = vld [vmem:[%s743_s19 + $0x108] sm:$0xff] }
  0x99   : > { %v448_v60 = vmul.f32 %v301_v58, %v217_v54  ;;  %v449_v61 = vmul.f32 %v301_v58, %v218_v55  ;;  %v446_v62 = vmul.f32 %v296_v59, %v215_v56  ;;  %v447_v63 = vmul.f32 %v296_v59, %v216_v57 }
  0x9b   : > { %515 = vst [vmem:[%s752_s22 + $0x50] sm:$0xff] %v448_v60  ;;  %516 = vst.msk [vmem:[%s752_s22 + $0x58] sm:$0xff] %vm505_vm0, %v449_v61  ;;  %v245_v60 = vld [vmem:[%s743_s19 + $0x130] sm:$0xff]  ;;  %v246_v61 = vld [vmem:[%s743_s19 + $0x138] sm:$0xff] }
  0x9c   : > { %513 = vst [vmem:[%s752_s22 + $0x40] sm:$0xff] %v446_v62  ;;  %514 = vst.msk [vmem:[%s752_s22 + $0x48] sm:$0xff] %vm505_vm0, %v447_v63  ;;  %v311_v4 = vpop.permute.xlu1 %310  ;;  %v306_v5 = vpop.permute.xlu0 %305  ;;  %v243_v62 = vld [vmem:[%s743_s19 + $0x120] sm:$0xff]  ;;  %v244_v63 = vld [vmem:[%s743_s19 + $0x128] sm:$0xff] }
  0x9d   : > { %v452_v6 = vmul.f32 %v311_v4, %v221_v0  ;;  %v453_v7 = vmul.f32 %v311_v4, %v222_v1  ;;  %v450_v8 = vmul.f32 %v306_v5, %v219_v2  ;;  %v451_v9 = vmul.f32 %v306_v5, %v220_v3 }
  0x9f   : > { %519 = vst [vmem:[%s752_s22 + $0x70] sm:$0xff] %v452_v6  ;;  %520 = vst.msk [vmem:[%s752_s22 + $0x78] sm:$0xff] %vm505_vm0, %v453_v7  ;;  %v249_v6 = vld [vmem:[%s743_s19 + $0x150] sm:$0xff]  ;;  %v250_v7 = vld [vmem:[%s743_s19 + $0x158] sm:$0xff] }
  0xa0   : > { %517 = vst [vmem:[%s752_s22 + $0x60] sm:$0xff] %v450_v8  ;;  %518 = vst.msk [vmem:[%s752_s22 + $0x68] sm:$0xff] %vm505_vm0, %v451_v9  ;;  %v321_v14 = vpop.permute.xlu1 %320  ;;  %v316_v15 = vpop.permute.xlu0 %315  ;;  %v247_v8 = vld [vmem:[%s743_s19 + $0x140] sm:$0xff]  ;;  %v248_v9 = vld [vmem:[%s743_s19 + $0x148] sm:$0xff] }
  0xa1   : > { %v456_v16 = vmul.f32 %v321_v14, %v225_v10  ;;  %v457_v17 = vmul.f32 %v321_v14, %v226_v11  ;;  %v454_v18 = vmul.f32 %v316_v15, %v223_v12  ;;  %v455_v19 = vmul.f32 %v316_v15, %v224_v13 }
  0xa3   : > { %523 = vst [vmem:[%s752_s22 + $0x90] sm:$0xff] %v456_v16  ;;  %524 = vst.msk [vmem:[%s752_s22 + $0x98] sm:$0xff] %vm505_vm0, %v457_v17  ;;  %v253_v16 = vld [vmem:[%s743_s19 + $0x170] sm:$0xff]  ;;  %v254_v17 = vld [vmem:[%s743_s19 + $0x178] sm:$0xff] }
  0xa4   : > { %521 = vst [vmem:[%s752_s22 + $0x80] sm:$0xff] %v454_v18  ;;  %522 = vst.msk [vmem:[%s752_s22 + $0x88] sm:$0xff] %vm505_vm0, %v455_v19  ;;  %v331_v24 = vpop.permute.xlu1 %330  ;;  %v326_v25 = vpop.permute.xlu0 %325  ;;  %v251_v18 = vld [vmem:[%s743_s19 + $0x160] sm:$0xff]  ;;  %v252_v19 = vld [vmem:[%s743_s19 + $0x168] sm:$0xff] }
  0xa5   : > { %v460_v26 = vmul.f32 %v331_v24, %v229_v20  ;;  %v461_v27 = vmul.f32 %v331_v24, %v230_v21  ;;  %v458_v28 = vmul.f32 %v326_v25, %v227_v22  ;;  %v459_v29 = vmul.f32 %v326_v25, %v228_v23 }
  0xa7   : > { %527 = vst [vmem:[%s752_s22 + $0xb0] sm:$0xff] %v460_v26  ;;  %528 = vst.msk [vmem:[%s752_s22 + $0xb8] sm:$0xff] %vm505_vm0, %v461_v27  ;;  %v257_v26 = vld [vmem:[%s743_s19 + $0x190] sm:$0xff]  ;;  %v258_v27 = vld [vmem:[%s743_s19 + $0x198] sm:$0xff] }
  0xa8   : > { %525 = vst [vmem:[%s752_s22 + $0xa0] sm:$0xff] %v458_v28  ;;  %526 = vst.msk [vmem:[%s752_s22 + $0xa8] sm:$0xff] %vm505_vm0, %v459_v29  ;;  %v341_v34 = vpop.permute.xlu1 %340  ;;  %v336_v35 = vpop.permute.xlu0 %335  ;;  %v255_v28 = vld [vmem:[%s743_s19 + $0x180] sm:$0xff]  ;;  %v256_v29 = vld [vmem:[%s743_s19 + $0x188] sm:$0xff] }
  0xa9   : > { %v464_v36 = vmul.f32 %v341_v34, %v233_v30  ;;  %v465_v37 = vmul.f32 %v341_v34, %v234_v31  ;;  %v462_v38 = vmul.f32 %v336_v35, %v231_v32  ;;  %v463_v39 = vmul.f32 %v336_v35, %v232_v33 }
  0xab   : > { %531 = vst [vmem:[%s752_s22 + $0xd0] sm:$0xff] %v464_v36  ;;  %532 = vst.msk [vmem:[%s752_s22 + $0xd8] sm:$0xff] %vm505_vm0, %v465_v37  ;;  %v261_v36 = vld [vmem:[%s743_s19 + $0x1b0] sm:$0xff]  ;;  %v262_v37 = vld [vmem:[%s743_s19 + $0x1b8] sm:$0xff] }
  0xac   : > { %529 = vst [vmem:[%s752_s22 + $0xc0] sm:$0xff] %v462_v38  ;;  %530 = vst.msk [vmem:[%s752_s22 + $0xc8] sm:$0xff] %vm505_vm0, %v463_v39  ;;  %v351_v44 = vpop.permute.xlu1 %350  ;;  %v346_v45 = vpop.permute.xlu0 %345  ;;  %v259_v38 = vld [vmem:[%s743_s19 + $0x1a0] sm:$0xff]  ;;  %v260_v39 = vld [vmem:[%s743_s19 + $0x1a8] sm:$0xff] }
  0xad   : > { %v468_v46 = vmul.f32 %v351_v44, %v237_v40  ;;  %v469_v47 = vmul.f32 %v351_v44, %v238_v41  ;;  %v466_v48 = vmul.f32 %v346_v45, %v235_v42  ;;  %v467_v49 = vmul.f32 %v346_v45, %v236_v43 }
  0xaf   : > { %535 = vst [vmem:[%s752_s22 + $0xf0] sm:$0xff] %v468_v46  ;;  %536 = vst.msk [vmem:[%s752_s22 + $0xf8] sm:$0xff] %vm505_vm0, %v469_v47  ;;  %v265_v46 = vld [vmem:[%s743_s19 + $0x1d0] sm:$0xff]  ;;  %v266_v47 = vld [vmem:[%s743_s19 + $0x1d8] sm:$0xff] }
  0xb0   : > { %533 = vst [vmem:[%s752_s22 + $0xe0] sm:$0xff] %v466_v48  ;;  %534 = vst.msk [vmem:[%s752_s22 + $0xe8] sm:$0xff] %vm505_vm0, %v467_v49  ;;  %v361_v54 = vpop.permute.xlu1 %360  ;;  %v356_v55 = vpop.permute.xlu0 %355  ;;  %v263_v48 = vld [vmem:[%s743_s19 + $0x1c0] sm:$0xff]  ;;  %v264_v49 = vld [vmem:[%s743_s19 + $0x1c8] sm:$0xff] }
  0xb1   : > { %v472_v56 = vmul.f32 %v361_v54, %v241_v50  ;;  %v473_v57 = vmul.f32 %v361_v54, %v242_v51  ;;  %v470_v58 = vmul.f32 %v356_v55, %v239_v52  ;;  %v471_v59 = vmul.f32 %v356_v55, %v240_v53 }
  0xb3   : > { %539 = vst [vmem:[%s752_s22 + $0x110] sm:$0xff] %v472_v56  ;;  %540 = vst.msk [vmem:[%s752_s22 + $0x118] sm:$0xff] %vm505_vm0, %v473_v57  ;;  %v269_v56 = vld [vmem:[%s743_s19 + $0x1f0] sm:$0xff]  ;;  %v270_v57 = vld [vmem:[%s743_s19 + $0x1f8] sm:$0xff] }
  0xb4   : > { %537 = vst [vmem:[%s752_s22 + $0x100] sm:$0xff] %v470_v58  ;;  %538 = vst.msk [vmem:[%s752_s22 + $0x108] sm:$0xff] %vm505_vm0, %v471_v59  ;;  %v371_v0 = vpop.permute.xlu1 %370  ;;  %v366_v1 = vpop.permute.xlu0 %365  ;;  %v267_v58 = vld [vmem:[%s743_s19 + $0x1e0] sm:$0xff]  ;;  %v268_v59 = vld [vmem:[%s743_s19 + $0x1e8] sm:$0xff] }
  0xb5   : > { %v476_v2 = vmul.f32 %v371_v0, %v245_v60  ;;  %v477_v3 = vmul.f32 %v371_v0, %v246_v61  ;;  %v474_v4 = vmul.f32 %v366_v1, %v243_v62  ;;  %v475_v5 = vmul.f32 %v366_v1, %v244_v63 }
  0xb7   : > { %543 = vst [vmem:[%s752_s22 + $0x130] sm:$0xff] %v476_v2  ;;  %544 = vst.msk [vmem:[%s752_s22 + $0x138] sm:$0xff] %vm505_vm0, %v477_v3  ;;  %v271_v2 = vld [vmem:[%s743_s19 + $0x200] sm:$0xff]  ;;  %v272_v3 = vld [vmem:[%s743_s19 + $0x208] sm:$0xff] }
  0xb8   : > { %541 = vst [vmem:[%s752_s22 + $0x120] sm:$0xff] %v474_v4  ;;  %542 = vst.msk [vmem:[%s752_s22 + $0x128] sm:$0xff] %vm505_vm0, %v475_v5  ;;  %v381_v10 = vpop.permute.xlu1 %380  ;;  %v376_v11 = vpop.permute.xlu0 %375 }
  0xb9   : > { %v480_v12 = vmul.f32 %v381_v10, %v249_v6  ;;  %v481_v13 = vmul.f32 %v381_v10, %v250_v7  ;;  %v478_v14 = vmul.f32 %v376_v11, %v247_v8  ;;  %v479_v15 = vmul.f32 %v376_v11, %v248_v9 }
  0xbb   : > { %547 = vst [vmem:[%s752_s22 + $0x150] sm:$0xff] %v480_v12  ;;  %548 = vst.msk [vmem:[%s752_s22 + $0x158] sm:$0xff] %vm505_vm0, %v481_v13 }
  0xbc   : > { %545 = vst [vmem:[%s752_s22 + $0x140] sm:$0xff] %v478_v14  ;;  %546 = vst.msk [vmem:[%s752_s22 + $0x148] sm:$0xff] %vm505_vm0, %v479_v15  ;;  %v391_v20 = vpop.permute.xlu1 %390  ;;  %v386_v21 = vpop.permute.xlu0 %385 }
  0xbd   : > { %v484_v22 = vmul.f32 %v391_v20, %v253_v16  ;;  %v485_v23 = vmul.f32 %v391_v20, %v254_v17  ;;  %v482_v24 = vmul.f32 %v386_v21, %v251_v18  ;;  %v483_v25 = vmul.f32 %v386_v21, %v252_v19 }
  0xbf   : > { %551 = vst [vmem:[%s752_s22 + $0x170] sm:$0xff] %v484_v22  ;;  %552 = vst.msk [vmem:[%s752_s22 + $0x178] sm:$0xff] %vm505_vm0, %v485_v23 }
  0xc0   : > { %549 = vst [vmem:[%s752_s22 + $0x160] sm:$0xff] %v482_v24  ;;  %550 = vst.msk [vmem:[%s752_s22 + $0x168] sm:$0xff] %vm505_vm0, %v483_v25  ;;  %v401_v30 = vpop.permute.xlu1 %400  ;;  %v396_v31 = vpop.permute.xlu0 %395 }
  0xc1   : > { %v488_v32 = vmul.f32 %v401_v30, %v257_v26  ;;  %v489_v33 = vmul.f32 %v401_v30, %v258_v27  ;;  %v486_v34 = vmul.f32 %v396_v31, %v255_v28  ;;  %v487_v35 = vmul.f32 %v396_v31, %v256_v29 }
  0xc3   : > { %555 = vst [vmem:[%s752_s22 + $0x190] sm:$0xff] %v488_v32  ;;  %556 = vst.msk [vmem:[%s752_s22 + $0x198] sm:$0xff] %vm505_vm0, %v489_v33 }
  0xc4   : > { %553 = vst [vmem:[%s752_s22 + $0x180] sm:$0xff] %v486_v34  ;;  %554 = vst.msk [vmem:[%s752_s22 + $0x188] sm:$0xff] %vm505_vm0, %v487_v35  ;;  %v411_v40 = vpop.permute.xlu1 %410  ;;  %v406_v41 = vpop.permute.xlu0 %405 }
  0xc5   : > { %v492_v42 = vmul.f32 %v411_v40, %v261_v36  ;;  %v493_v43 = vmul.f32 %v411_v40, %v262_v37  ;;  %v490_v44 = vmul.f32 %v406_v41, %v259_v38  ;;  %v491_v45 = vmul.f32 %v406_v41, %v260_v39 }
  0xc7   : > { %559 = vst [vmem:[%s752_s22 + $0x1b0] sm:$0xff] %v492_v42  ;;  %560 = vst.msk [vmem:[%s752_s22 + $0x1b8] sm:$0xff] %vm505_vm0, %v493_v43 }
  0xc8   : > { %557 = vst [vmem:[%s752_s22 + $0x1a0] sm:$0xff] %v490_v44  ;;  %558 = vst.msk [vmem:[%s752_s22 + $0x1a8] sm:$0xff] %vm505_vm0, %v491_v45  ;;  %v421_v50 = vpop.permute.xlu1 %420  ;;  %v416_v51 = vpop.permute.xlu0 %415 }
  0xc9   : > { %v496_v52 = vmul.f32 %v421_v50, %v265_v46  ;;  %v497_v53 = vmul.f32 %v421_v50, %v266_v47  ;;  %v494_v54 = vmul.f32 %v416_v51, %v263_v48  ;;  %v495_v55 = vmul.f32 %v416_v51, %v264_v49 }
  0xcb   : > { %563 = vst [vmem:[%s752_s22 + $0x1d0] sm:$0xff] %v496_v52  ;;  %564 = vst.msk [vmem:[%s752_s22 + $0x1d8] sm:$0xff] %vm505_vm0, %v497_v53 }
  0xcc   : > { %561 = vst [vmem:[%s752_s22 + $0x1c0] sm:$0xff] %v494_v54  ;;  %562 = vst.msk [vmem:[%s752_s22 + $0x1c8] sm:$0xff] %vm505_vm0, %v495_v55  ;;  %v431_v60 = vpop.permute.xlu1 %430  ;;  %v426_v61 = vpop.permute.xlu0 %425 }
  0xcd   : > { %v500_v62 = vmul.f32 %v431_v60, %v269_v56  ;;  %v501_v63 = vmul.f32 %v431_v60, %v270_v57  ;;  %v498_v0 = vmul.f32 %v426_v61, %v267_v58  ;;  %v499_v1 = vmul.f32 %v426_v61, %v268_v59 }
  0xcf   : > { %567 = vst [vmem:[%s752_s22 + $0x1f0] sm:$0xff] %v500_v62  ;;  %568 = vst.msk [vmem:[%s752_s22 + $0x1f8] sm:$0xff] %vm505_vm0, %v501_v63 }
  0xd0   : > { %565 = vst [vmem:[%s752_s22 + $0x1e0] sm:$0xff] %v498_v0  ;;  %566 = vst.msk [vmem:[%s752_s22 + $0x1e8] sm:$0xff] %vm505_vm0, %v499_v1  ;;  %v436_v4 = vpop.permute.xlu0 %435 }
  0xd1   : > { %v502_v5 = vmul.f32 %v436_v4, %v271_v2  ;;  %v503_v6 = vmul.f32 %v436_v4, %v272_v3 }
  0xd3   : > { %569 = vst [vmem:[%s752_s22 + $0x200] sm:$0xff] %v502_v5  ;;  %570 = vst.msk [vmem:[%s752_s22 + $0x208] sm:$0xff] %vm505_vm0, %v503_v6 }
  0xd4 PF: > { %s12_s9 = sadd.s32 1, %s672_s9  }
  0xd5   : > { %p9_p4 = scmp.ge.s32.totalorder %s12_s9, 6  }
  0xd7   :  { %11 = sbr.rel (!%p9_p4) target bundleno = 1 (0x1), region = 61 }

</bundles_post_ra>
